<compile_context>
chip_gen: v5e
topology: v5e:2x2
jax: 0.10.0
libtpu: 0.0.40
codegen_flags: <defaults>
</compile_context>

<pallas_src>
import functools

import jax
import jax.numpy as jnp
from jax.experimental import pallas as pl
from jax.experimental.pallas import tpu as pltpu


# ------------------------------- kernel ------------------------------------ #

def _bf_layernorm_kernel(x_ref, w_ref, o_ref, *, eps):
    """Bias-free LayerNorm over the last axis of a (TR, C) row block."""
    x = x_ref[...].astype(jnp.float32)                     # (TR, C)
    w = w_ref[...].astype(jnp.float32)                     # (1, C), broadcasts

    # Two-pass (centered) biased variance — matches torch.var(unbiased=False).
    mean = jnp.mean(x, axis=-1, keepdims=True)             # (TR, 1)
    xc = x - mean
    var = jnp.mean(xc * xc, axis=-1, keepdims=True)        # (TR, 1)

    inv_sigma = jax.lax.rsqrt(var + jnp.float32(eps))
    # Bias-free: scale x itself (NOT x - mean) by 1/sigma, then by weight.
    o_ref[...] = (x * inv_sigma * w).astype(o_ref.dtype)


# ------------------------------- wrapper ------------------------------------ #

def _choose_row_tile(rows):
    """Large row tile (multiple of 8, <= 4096) with >= 2 grid steps when possible."""
    max_tile = 4096
    if rows <= 8:
        return 8
    # Cap at ~rows/2 (rounded down to a multiple of 8) so the grid has at
    # least 2 steps -> both v7x TensorCores get work under "parallel".
    half = max(8, (rows // 2) // 8 * 8)
    return min(max_tile, half)


def bias_free_layer_norm(x, weight, eps=1e-5):
    """x: (..., C), weight: (C,). Returns x / sqrt(var(x,-1)+eps) * weight."""
    orig_shape = x.shape
    c = orig_shape[-1]
    assert weight.shape == (c,)

    x2 = x.reshape(-1, c)                                  # keep original dtype in HBM
    rows = x2.shape[0]
    tr = _choose_row_tile(rows)
    grid = (pl.cdiv(rows, tr),)

    kernel = functools.partial(_bf_layernorm_kernel, eps=eps)

    out = pl.pallas_call(
        kernel,
        out_shape=jax.ShapeDtypeStruct((rows, c), x2.dtype),
        grid=grid,
        in_specs=[
            # Full-width channel blocks: last block dim == full array dim (C),
            # so no (8,128) padding is required and the DMA is contiguous.
            pl.BlockSpec((tr, c), lambda i: (i, 0)),       # row tile of x
            pl.BlockSpec((1, c), lambda i: (0, 0)),        # weight row (tiny, resident)
        ],
        out_specs=pl.BlockSpec((tr, c), lambda i: (i, 0)),
        compiler_params=pltpu.CompilerParams(
            dimension_semantics=("parallel",),             # rows independent
        ),
    )(x2, weight.reshape(1, c))

    return out.reshape(orig_shape)


# ------------------------------ reference ----------------------------------- #

def _reference(x, weight, eps=1e-5):
    xf = x.astype(jnp.float32)
    var = jnp.var(xf, axis=-1, keepdims=True)              # biased (ddof=0)
    return (xf / jnp.sqrt(var + eps) * weight.astype(jnp.float32)).astype(x.dtype)


# -------------------------------- main -------------------------------------- #

if __name__ == "__main__":
    key = jax.random.PRNGKey(0)
    kx, kw = jax.random.split(key)

    # FSFANet applies BiasFree_LayerNorm to to_3d(x): (B, H*W, C) with C=48.
    B, HW, C = 2, 16 * 16, 48
    x = jax.random.normal(kx, (B, HW, C), jnp.float32)
    # Module initializes weight to ones; use a non-trivial weight to exercise
    # the scale path (same forward semantics).
    weight = 1.0 + 0.1 * jax.random.normal(kw, (C,), jnp.float32)

    out = jax.jit(bias_free_layer_norm)(x, weight)
    out = jax.block_until_ready(out)

    ref = _reference(x, weight)
    assert out.shape == x.shape
    assert bool(jnp.all(jnp.isfinite(out)))
    assert bool(jnp.allclose(out, ref, atol=1e-4, rtol=1e-4)), (
        float(jnp.max(jnp.abs(out - ref))))
    print("KERNEL_OK")
</pallas_src>

<mosaic_0001>
module attributes {stable_mosaic.version = 11 : i64} {
  func.func @_bf_layernorm_kernel(%arg0: i32, %arg1: memref<256x48xf32, #tpu.memory_space<vmem>>, %arg2: memref<1x48xf32, #tpu.memory_space<vmem>>, %arg3: memref<256x48xf32, #tpu.memory_space<vmem>>) attributes {dimension_semantics = [#tpu.dimension_semantics<parallel>], iteration_bounds = array<i64: 2>, scalar_prefetch = 0 : i64, scratch_operands = 0 : i64, tpu.core_type = #tpu.core_type<tc>, window_params = [{transform_indices = @transform_0, window_bounds = array<i64: 256, 48>}, {pipeline_mode = #tpu.pipeline_mode<synchronous>, transform_indices = @transform_1, window_bounds = array<i64: 1, 48>}, {transform_indices = @transform_2, window_bounds = array<i64: 256, 48>}]} {
    %c0 = arith.constant 0 : index
    %c0_0 = arith.constant 0 : index
    %0 = vector.load %arg1[%c0, %c0_0] : memref<256x48xf32, #tpu.memory_space<vmem>>, vector<256x48xf32>
    %c0_1 = arith.constant 0 : index
    %c0_2 = arith.constant 0 : index
    %1 = vector.load %arg2[%c0_1, %c0_2] : memref<1x48xf32, #tpu.memory_space<vmem>>, vector<1x48xf32>
    %cst = arith.constant dense<0.000000e+00> : vector<256xf32>
    %2 = vector.multi_reduction <add>, %0, %cst [1] : vector<256x48xf32> to vector<256xf32>
    %3 = vector.shape_cast %2 : vector<256xf32> to vector<256x1xf32>
    %cst_3 = arith.constant 4.800000e+01 : f32
    %4 = vector.broadcast %cst_3 : f32 to vector<256x1xf32>
    %5 = arith.divf %3, %4 : vector<256x1xf32>
    %6 = vector.broadcast %5 : vector<256x1xf32> to vector<256x48xf32>
    %7 = arith.subf %0, %6 : vector<256x48xf32>
    %8 = arith.mulf %7, %7 : vector<256x48xf32>
    %cst_4 = arith.constant dense<0.000000e+00> : vector<256xf32>
    %9 = vector.multi_reduction <add>, %8, %cst_4 [1] : vector<256x48xf32> to vector<256xf32>
    %10 = vector.shape_cast %9 : vector<256xf32> to vector<256x1xf32>
    %cst_5 = arith.constant 4.800000e+01 : f32
    %11 = vector.broadcast %cst_5 : f32 to vector<256x1xf32>
    %12 = arith.divf %10, %11 : vector<256x1xf32>
    %cst_6 = arith.constant 9.99999974E-6 : f32
    %13 = vector.broadcast %cst_6 : f32 to vector<256x1xf32>
    %14 = arith.addf %12, %13 : vector<256x1xf32>
    %15 = math.rsqrt %14 : vector<256x1xf32>
    %16 = vector.broadcast %15 : vector<256x1xf32> to vector<256x48xf32>
    %17 = arith.mulf %0, %16 : vector<256x48xf32>
    %18 = vector.broadcast %1 : vector<1x48xf32> to vector<256x48xf32>
    %19 = arith.mulf %17, %18 : vector<256x48xf32>
    %c0_7 = arith.constant 0 : index
    %c0_8 = arith.constant 0 : index
    %20 = vector.load %arg3[%c0_7, %c0_8] : memref<256x48xf32, #tpu.memory_space<vmem>>, vector<256x48xf32>
    tpu.vector_store %arg3[%c0_7, %c0_8], %19 {strides = array<i32>} : memref<256x48xf32, #tpu.memory_space<vmem>>, vector<256x48xf32>,
    return
  }
  func.func @transform_0(%arg0: i32) -> (i32, i32) {
    %c0_i32 = arith.constant 0 : i32
    %c0_i32_0 = arith.constant 0 : i32
    return %arg0, %c0_i32 : i32, i32
  }
  func.func @transform_1(%arg0: i32) -> (i32, i32) {
    %c0_i32 = arith.constant 0 : i32
    %c0_i32_0 = arith.constant 0 : i32
    %c0_i32_1 = arith.constant 0 : i32
    return %c0_i32, %c0_i32_0 : i32, i32
  }
  func.func @transform_2(%arg0: i32) -> (i32, i32) {
    %c0_i32 = arith.constant 0 : i32
    %c0_i32_0 = arith.constant 0 : i32
    return %arg0, %c0_i32 : i32, i32
  }
}

</mosaic_0001>

<bundles_post_ra>
// kernel: bias_free_layer_norm.1
= control target key start
LH: loop header
LB: loop body
LE: loop exit
PB: predicated region body
PF: predicated region fallthrough
CT: control target
= control target key end

     0   :  { %s1147_s9 = smov 0   ;;  %s2056_s0 = inlined_call_operand.vmem [shape: f32[512,48], index: 0, kind: input, shape index: {}]   ;;  %s2057_s1 = inlined_call_operand.vmem [shape: f32[1,48], index: 1, kind: input, shape index: {}]   ;;  %s2058_s2 = inlined_call_operand.vmem [shape: f32[512,48], index: 2, kind: output, shape index: {}]  }
   0x1 LB: > { %s1015_s10 = sadd.s32 4294967295, %s1129_s9   ;;  %p1019_p0 = scmp.ge.s32.totalorder %s1129_s9, 1  ;;  %s1129_s9 = sphi %s1147_s9, %s12_s9  }
   0x2   : > { %p113_p1 = scmp.lt.s32.totalorder %s1129_s9, 3 }
   0x4   : > { %p114_p2 = pnand %p1019_p0, %p113_p1 }
   0x5   : > { %s1020_s11 = sshll.u32 (!%p114_p2), %s1015_s10, 5 }
   0x6   : > { %117 = sbr.rel (%p114_p2) target bundleno = 385 (0x181), region = 28  ;;  %p136_p3 = scmp.lt.s32.totalorder (!%p114_p2), %s1020_s11, 63 }
   0xb   : > { %s2082_s11 = smov (!%p136_p3, %s1020_s11), 63  ;;  %vm180_vm0 = vcmask 392192  }
   0xc   : > { %s1021_s12 = sshll.u32 %s2082_s11, 3 }
   0xd   : > { %s1163_s15 = scalar_lea.vmem %s2056_s0, %s1021_s12  ;;  %s1478_s20 = scalar_lea.vmem %s2058_s2, %s1021_s12 }
   0xe   : > { %v1166_v0 = vld [vmem:[%s1163_s15 + $0x10] sm:$0xff]  ;;  %v1169_v1 = vld [vmem:[%s1163_s15] sm:$0xff]  ;;  %v1181_v6 = vld [vmem:[%s1163_s15 + $0x18] sm:$0xff] }
   0xf   : > { %v1172_v2 = vld [vmem:[%s1163_s15 + $0x20] sm:$0xff]  ;;  %v187_v3 = vsel %vm180_vm0, %v1166_v0, 0.0  ;;  %v181_v4 = vsel %vm180_vm0, %v1169_v1, 0.0  ;;  %v1184_v7 = vld [vmem:[%s1163_s15 + $0x8] sm:$0xff]  ;;  %v190_v9 = vsel %vm180_vm0, %v1181_v6, 0.0  ;;  %v1196_v12 = vld [vmem:[%s1163_s15 + $0x30] sm:$0xff] }
  0x10   : > { %v193_v5 = vsel %vm180_vm0, %v1172_v2, 0.0  ;;  %188 = vadd.xlane.f32.xlu1 %v187_v3  ;;  %182 = vadd.xlane.f32.xlu0 %v181_v4  ;;  %v1187_v8 = vld [vmem:[%s1163_s15 + $0x28] sm:$0xff]  ;;  %v184_v10 = vsel %vm180_vm0, %v1184_v7, 0.0  ;;  %v1199_v13 = vld [vmem:[%s1163_s15 + $0x38] sm:$0xff]  ;;  %v1202_v14 = vld [vmem:[%s1163_s15 + $0x40] sm:$0xff]  ;;  %v199_v15 = vsel %vm180_vm0, %v1196_v12, 0.0 }
  0x11   : > { %194 = vadd.xlane.f32.xlu2 %v193_v5  ;;  %v196_v11 = vsel %vm180_vm0, %v1187_v8, 0.0  ;;  %v202_v16 = vsel %vm180_vm0, %v1199_v13, 0.0  ;;  %v205_v17 = vsel %vm180_vm0, %v1202_v14, 0.0  ;;  %v1211_v18 = vld [vmem:[%s1163_s15 + $0x48] sm:$0xff]  ;;  %v1214_v19 = vld [vmem:[%s1163_s15 + $0x50] sm:$0xff]  ;;  %v1217_v20 = vld [vmem:[%s1163_s15 + $0x58] sm:$0xff] }
  0x12   : > { %v208_v21 = vsel %vm180_vm0, %v1211_v18, 0.0  ;;  %v211_v22 = vsel %vm180_vm0, %v1214_v19, 0.0  ;;  %v214_v23 = vsel %vm180_vm0, %v1217_v20, 0.0  ;;  %v1226_v24 = vld [vmem:[%s1163_s15 + $0x60] sm:$0xff]  ;;  %v1229_v25 = vld [vmem:[%s1163_s15 + $0x68] sm:$0xff]  ;;  %v1232_v26 = vld [vmem:[%s1163_s15 + $0x70] sm:$0xff] }
  0x13   : > { %v217_v27 = vsel %vm180_vm0, %v1226_v24, 0.0  ;;  %v220_v28 = vsel %vm180_vm0, %v1229_v25, 0.0  ;;  %v223_v29 = vsel %vm180_vm0, %v1232_v26, 0.0  ;;  %v1241_v30 = vld [vmem:[%s1163_s15 + $0x78] sm:$0xff]  ;;  %v1244_v31 = vld [vmem:[%s1163_s15 + $0x80] sm:$0xff]  ;;  %v1247_v32 = vld [vmem:[%s1163_s15 + $0x88] sm:$0xff] }
  0x14   : > { %v226_v33 = vsel %vm180_vm0, %v1241_v30, 0.0  ;;  %v229_v34 = vsel %vm180_vm0, %v1244_v31, 0.0  ;;  %v232_v35 = vsel %vm180_vm0, %v1247_v32, 0.0  ;;  %v1256_v36 = vld [vmem:[%s1163_s15 + $0x90] sm:$0xff]  ;;  %v1259_v37 = vld [vmem:[%s1163_s15 + $0x98] sm:$0xff]  ;;  %v1262_v38 = vld [vmem:[%s1163_s15 + $0xa0] sm:$0xff] }
  0x15   : > { %v235_v39 = vsel %vm180_vm0, %v1256_v36, 0.0  ;;  %v238_v40 = vsel %vm180_vm0, %v1259_v37, 0.0  ;;  %v241_v41 = vsel %vm180_vm0, %v1262_v38, 0.0  ;;  %v1271_v42 = vld [vmem:[%s1163_s15 + $0xa8] sm:$0xff]  ;;  %v1274_v43 = vld [vmem:[%s1163_s15 + $0xb0] sm:$0xff]  ;;  %v1277_v44 = vld [vmem:[%s1163_s15 + $0xb8] sm:$0xff] }
  0x16   : > { %v244_v45 = vsel %vm180_vm0, %v1271_v42, 0.0  ;;  %v247_v46 = vsel %vm180_vm0, %v1274_v43, 0.0  ;;  %v250_v47 = vsel %vm180_vm0, %v1277_v44, 0.0  ;;  %v1286_v48 = vld [vmem:[%s1163_s15 + $0xc0] sm:$0xff]  ;;  %v1289_v49 = vld [vmem:[%s1163_s15 + $0xc8] sm:$0xff]  ;;  %v1292_v50 = vld [vmem:[%s1163_s15 + $0xd0] sm:$0xff] }
  0x17   : > { %v253_v51 = vsel %vm180_vm0, %v1286_v48, 0.0  ;;  %v256_v52 = vsel %vm180_vm0, %v1289_v49, 0.0  ;;  %v259_v53 = vsel %vm180_vm0, %v1292_v50, 0.0  ;;  %v1301_v54 = vld [vmem:[%s1163_s15 + $0xd8] sm:$0xff]  ;;  %v1304_v55 = vld [vmem:[%s1163_s15 + $0xe0] sm:$0xff]  ;;  %v1307_v56 = vld [vmem:[%s1163_s15 + $0xe8] sm:$0xff] }
  0x18   : > { %191 = vadd.xlane.f32.xlu1 %v190_v9  ;;  %185 = vadd.xlane.f32.xlu0 %v184_v10  ;;  %v262_v57 = vsel %vm180_vm0, %v1301_v54, 0.0  ;;  %v265_v58 = vsel %vm180_vm0, %v1304_v55, 0.0  ;;  %v268_v59 = vsel %vm180_vm0, %v1307_v56, 0.0  ;;  %v1316_v60 = vld [vmem:[%s1163_s15 + $0xf0] sm:$0xff]  ;;  %v1319_v61 = vld [vmem:[%s1163_s15 + $0xf8] sm:$0xff]  ;;  %v1131_v3 = vmov 48.0  }
  0x19   : > { %197 = vadd.xlane.f32.xlu2 %v196_v11  ;;  %v271_v62 = vsel %vm180_vm0, %v1316_v60, 0.0  ;;  %v274_v63 = vsel %vm180_vm0, %v1319_v61, 0.0  ;;  %1036 = vrcp.f32 %v1131_v3 }
  0x1f   : > { %v1037_v4 = vpop.eup %1036 }
  0x20   : > { %200 = vadd.xlane.f32.xlu0 %v199_v15  ;;  %203 = vadd.xlane.f32.xlu1 %v202_v16  ;;  %v278_v5 = vmul.f32 48.0, %v1037_v4  ;;  %vm282_vm1 = vweird.f32 %v1037_v4 }
  0x21   : > { %206 = vadd.xlane.f32.xlu2 %v205_v17 }
  0x22   : > { %v279_v9 = vsub.f32 1.0, %v278_v5 }
  0x24   : > { %v280_v10 = vmul.f32 %v1037_v4, %v279_v9 }
  0x26   : > { %v281_v11 = vadd.f32 %v1037_v4, %v280_v10 }
  0x28   : > { %209 = vadd.xlane.f32.xlu0 %v208_v21  ;;  %212 = vadd.xlane.f32.xlu1 %v211_v22  ;;  %v1325_v15 = vsel %vm282_vm1, %v1037_v4, %v281_v11 }
  0x29   : > { %215 = vadd.xlane.f32.xlu2 %v214_v23 }
  0x30   : > { %218 = vadd.xlane.f32.xlu0 %v217_v27  ;;  %221 = vadd.xlane.f32.xlu1 %v220_v28 }
  0x31   : > { %224 = vadd.xlane.f32.xlu2 %v223_v29 }
  0x38   : > { %227 = vadd.xlane.f32.xlu0 %v226_v33  ;;  %230 = vadd.xlane.f32.xlu1 %v229_v34 }
  0x39   : > { %233 = vadd.xlane.f32.xlu2 %v232_v35 }
  0x40   : > { %236 = vadd.xlane.f32.xlu0 %v235_v39  ;;  %239 = vadd.xlane.f32.xlu1 %v238_v40 }
  0x41   : > { %242 = vadd.xlane.f32.xlu2 %v241_v41 }
  0x48   : > { %245 = vadd.xlane.f32.xlu0 %v244_v45  ;;  %248 = vadd.xlane.f32.xlu1 %v247_v46 }
  0x49   : > { %251 = vadd.xlane.f32.xlu2 %v250_v47 }
  0x50   : > { %254 = vadd.xlane.f32.xlu0 %v253_v51  ;;  %257 = vadd.xlane.f32.xlu1 %v256_v52 }
  0x51   : > { %260 = vadd.xlane.f32.xlu2 %v259_v53 }
  0x58   : > { %263 = vadd.xlane.f32.xlu0 %v262_v57  ;;  %266 = vadd.xlane.f32.xlu1 %v265_v58 }
  0x59   : > { %269 = vadd.xlane.f32.xlu2 %v268_v59 }
  0x60   : > { %272 = vadd.xlane.f32.xlu0 %v271_v62  ;;  %275 = vadd.xlane.f32.xlu1 %v274_v63 }
  0x83   : > { %v189_v16 = vpop.xlane.xlu1 %188  ;;  %v183_v17 = vpop.xlane.xlu0 %182 }
  0x84   : > { %v286_v21 = vmul.f32 %v1325_v15, %v189_v16  ;;  %v284_v22 = vmul.f32 %v1325_v15, %v183_v17  ;;  %v195_v23 = vpop.xlane.xlu2 %194 }
  0x85   : > { %v288_v41 = vmul.f32 %v1325_v15, %v195_v23 }
  0x86   : > { %v318_v27 = vsub.f32 %v1166_v0, %v286_v21  ;;  %v316_v28 = vsub.f32 %v1169_v1, %v284_v22 }
  0x87   : > { %v320_v58 = vsub.f32 %v1172_v2, %v288_v41 }
  0x88   : > { %v350_v29 = vmul.f32 %v318_v27, %v318_v27  ;;  %v348_v33 = vmul.f32 %v316_v28, %v316_v28 }
  0x89   : > { %v352_v21 = vmul.f32 %v320_v58, %v320_v58 }
  0x8a   : > { %v386_v34 = vsel %vm180_vm0, %v350_v29, 0.0  ;;  %v380_v35 = vsel %vm180_vm0, %v348_v33, 0.0 }
  0x8b   : > { %387 = vadd.xlane.f32.xlu1 %v386_v34  ;;  %v192_v39 = vpop.xlane.xlu1 %191  ;;  %381 = vadd.xlane.f32.xlu2 %v380_v35  ;;  %v186_v40 = vpop.xlane.xlu0 %185  ;;  %v392_v29 = vsel %vm180_vm0, %v352_v21, 0.0 }
  0x8c   : > { %v287_v45 = vmul.f32 %v1325_v15, %v192_v39  ;;  %v285_v46 = vmul.f32 %v1325_v15, %v186_v40  ;;  %v198_v47 = vpop.xlane.xlu2 %197 }
  0x8d   : > { %v289_v51 = vmul.f32 %v1325_v15, %v198_v47 }
  0x8e   : > { %v319_v52 = vsub.f32 %v1181_v6, %v287_v45  ;;  %v317_v53 = vsub.f32 %v1184_v7, %v285_v46 }
  0x8f   : > { %v321_v57 = vsub.f32 %v1187_v8, %v289_v51 }
  0x90   : > { %v351_v59 = vmul.f32 %v319_v52, %v319_v52  ;;  %v349_v62 = vmul.f32 %v317_v53, %v317_v53 }
  0x91   : > { %v353_v63 = vmul.f32 %v321_v57, %v321_v57 }
  0x92   : > { %v389_v3 = vsel %vm180_vm0, %v351_v59, 0.0  ;;  %v383_v4 = vsel %vm180_vm0, %v349_v62, 0.0 }
  0x93   : > { %390 = vadd.xlane.f32.xlu2 %v389_v3  ;;  %384 = vadd.xlane.f32.xlu0 %v383_v4  ;;  %v201_v5 = vpop.xlane.xlu0 %200  ;;  %v395_v9 = vsel %vm180_vm0, %v353_v63, 0.0  ;;  %v204_v10 = vpop.xlane.xlu1 %203 }
  0x94   : > { %v290_v11 = vmul.f32 %v1325_v15, %v201_v5  ;;  %v207_v16 = vpop.xlane.xlu2 %206  ;;  %396 = vadd.xlane.f32.xlu1 %v395_v9  ;;  %v291_v17 = vmul.f32 %v1325_v15, %v204_v10 }
  0x95   : > { %v292_v22 = vmul.f32 %v1325_v15, %v207_v16 }
  0x96   : > { %v322_v23 = vsub.f32 %v1196_v12, %v290_v11  ;;  %v323_v28 = vsub.f32 %v1199_v13, %v291_v17 }
  0x97   : > { %v324_v27 = vsub.f32 %v1202_v14, %v292_v22 }
  0x98   : > { %v354_v33 = vmul.f32 %v322_v23, %v322_v23  ;;  %v355_v51 = vmul.f32 %v323_v28, %v323_v28 }
  0x99   : > { %v356_v34 = vmul.f32 %v324_v27, %v324_v27 }
  0x9a   : > { %v398_v35 = vsel %vm180_vm0, %v354_v33, 0.0  ;;  %v401_v59 = vsel %vm180_vm0, %v355_v51, 0.0 }
  0x9b   : > { %393 = vadd.xlane.f32.xlu0 %v392_v29  ;;  %399 = vadd.xlane.f32.xlu2 %v398_v35  ;;  %v210_v39 = vpop.xlane.xlu0 %209  ;;  %v404_v40 = vsel %vm180_vm0, %v356_v34, 0.0  ;;  %v213_v41 = vpop.xlane.xlu1 %212 }
  0x9c   : > { %v293_v45 = vmul.f32 %v1325_v15, %v210_v39  ;;  %v216_v46 = vpop.xlane.xlu2 %215  ;;  %405 = vadd.xlane.f32.xlu1 %v404_v40  ;;  %v294_v47 = vmul.f32 %v1325_v15, %v213_v41 }
  0x9d   : > { %v295_v52 = vmul.f32 %v1325_v15, %v216_v46 }
  0x9e   : > { %v325_v53 = vsub.f32 %v1211_v18, %v293_v45  ;;  %v326_v58 = vsub.f32 %v1214_v19, %v294_v47 }
  0x9f   : > { %v327_v57 = vsub.f32 %v1217_v20, %v295_v52 }
  0xa0   : > { %v357_v62 = vmul.f32 %v325_v53, %v325_v53  ;;  %v358_v17 = vmul.f32 %v326_v58, %v326_v58 }
  0xa1   : > { %v359_v63 = vmul.f32 %v327_v57, %v327_v57 }
  0xa2   : > { %v407_v3 = vsel %vm180_vm0, %v357_v62, 0.0  ;;  %v410_v27 = vsel %vm180_vm0, %v358_v17, 0.0 }
  0xa3   : > { %402 = vadd.xlane.f32.xlu0 %v401_v59  ;;  %408 = vadd.xlane.f32.xlu2 %v407_v3  ;;  %v219_v4 = vpop.xlane.xlu0 %218  ;;  %v413_v5 = vsel %vm180_vm0, %v359_v63, 0.0  ;;  %v222_v9 = vpop.xlane.xlu1 %221 }
  0xa4   : > { %v296_v10 = vmul.f32 %v1325_v15, %v219_v4  ;;  %v225_v11 = vpop.xlane.xlu2 %224  ;;  %414 = vadd.xlane.f32.xlu1 %v413_v5  ;;  %v297_v16 = vmul.f32 %v1325_v15, %v222_v9 }
  0xa5   : > { %v298_v19 = vmul.f32 %v1325_v15, %v225_v11 }
  0xa6   : > { %v328_v21 = vsub.f32 %v1226_v24, %v296_v10  ;;  %v329_v23 = vsub.f32 %v1229_v25, %v297_v16 }
  0xa7   : > { %v330_v22 = vsub.f32 %v1232_v26, %v298_v19 }
  0xa8   : > { %v360_v28 = vmul.f32 %v328_v21, %v328_v21  ;;  %v361_v26 = vmul.f32 %v329_v23, %v329_v23 }
  0xa9   : > { %v362_v29 = vmul.f32 %v330_v22, %v330_v22 }
  0xaa   : > { %v416_v33 = vsel %vm180_vm0, %v360_v28, 0.0  ;;  %v419_v51 = vsel %vm180_vm0, %v361_v26, 0.0 }
  0xab   : > { %411 = vadd.xlane.f32.xlu0 %v410_v27  ;;  %417 = vadd.xlane.f32.xlu2 %v416_v33  ;;  %v228_v34 = vpop.xlane.xlu0 %227  ;;  %v422_v35 = vsel %vm180_vm0, %v362_v29, 0.0  ;;  %v231_v39 = vpop.xlane.xlu1 %230 }
  0xac   : > { %v299_v40 = vmul.f32 %v1325_v15, %v228_v34  ;;  %v234_v41 = vpop.xlane.xlu2 %233  ;;  %423 = vadd.xlane.f32.xlu1 %v422_v35  ;;  %v300_v24 = vmul.f32 %v1325_v15, %v231_v39 }
  0xad   : > { %v301_v25 = vmul.f32 %v1325_v15, %v234_v41 }
  0xae   : > { %v331_v45 = vsub.f32 %v1241_v30, %v299_v40  ;;  %v332_v47 = vsub.f32 %v1244_v31, %v300_v24 }
  0xaf   : > { %v333_v46 = vsub.f32 %v1247_v32, %v301_v25 }
  0xb0   : > { %v363_v52 = vmul.f32 %v331_v45, %v331_v45  ;;  %v364_v32 = vmul.f32 %v332_v47, %v332_v47 }
  0xb1   : > { %v365_v53 = vmul.f32 %v333_v46, %v333_v46 }
  0xb2   : > { %v425_v57 = vsel %vm180_vm0, %v363_v52, 0.0  ;;  %v428_v10 = vsel %vm180_vm0, %v364_v32, 0.0 }
  0xb3   : > { %420 = vadd.xlane.f32.xlu0 %v419_v51  ;;  %426 = vadd.xlane.f32.xlu2 %v425_v57  ;;  %v237_v58 = vpop.xlane.xlu0 %236  ;;  %v431_v59 = vsel %vm180_vm0, %v365_v53, 0.0  ;;  %v240_v62 = vpop.xlane.xlu1 %239 }
  0xb4   : > { %v302_v63 = vmul.f32 %v1325_v15, %v237_v58  ;;  %v243_v3 = vpop.xlane.xlu2 %242  ;;  %432 = vadd.xlane.f32.xlu1 %v431_v59  ;;  %v303_v30 = vmul.f32 %v1325_v15, %v240_v62 }
  0xb5   : > { %v304_v31 = vmul.f32 %v1325_v15, %v243_v3 }
  0xb6   : > { %v334_v4 = vsub.f32 %v1256_v36, %v302_v63  ;;  %v335_v9 = vsub.f32 %v1259_v37, %v303_v30 }
  0xb7   : > { %v336_v5 = vsub.f32 %v1262_v38, %v304_v31 }
  0xb8   : > { %v366_v11 = vmul.f32 %v334_v4, %v334_v4  ;;  %v367_v38 = vmul.f32 %v335_v9, %v335_v9 }
  0xb9   : > { %v368_v16 = vmul.f32 %v336_v5, %v336_v5 }
  0xba   : > { %v434_v17 = vsel %vm180_vm0, %v366_v11, 0.0  ;;  %v437_v34 = vsel %vm180_vm0, %v367_v38, 0.0 }
  0xbb   : > { %429 = vadd.xlane.f32.xlu0 %v428_v10  ;;  %435 = vadd.xlane.f32.xlu2 %v434_v17  ;;  %v246_v19 = vpop.xlane.xlu0 %245  ;;  %v440_v21 = vsel %vm180_vm0, %v368_v16, 0.0  ;;  %v249_v22 = vpop.xlane.xlu1 %248 }
  0xbc   : > { %v305_v23 = vmul.f32 %v1325_v15, %v246_v19  ;;  %v252_v27 = vpop.xlane.xlu2 %251  ;;  %441 = vadd.xlane.f32.xlu1 %v440_v21  ;;  %v306_v36 = vmul.f32 %v1325_v15, %v249_v22 }
  0xbd   : > { %v307_v37 = vmul.f32 %v1325_v15, %v252_v27 }
  0xbe   : > { %v337_v28 = vsub.f32 %v1271_v42, %v305_v23  ;;  %v338_v33 = vsub.f32 %v1274_v43, %v306_v36 }
  0xbf   : > { %v339_v29 = vsub.f32 %v1277_v44, %v307_v37 }
  0xc0   : > { %v369_v35 = vmul.f32 %v337_v28, %v337_v28  ;;  %v370_v44 = vmul.f32 %v338_v33, %v338_v33 }
  0xc1   : > { %v371_v39 = vmul.f32 %v339_v29, %v339_v29 }
  0xc2   : > { %v443_v40 = vsel %vm180_vm0, %v369_v35, 0.0  ;;  %v446_v52 = vsel %vm180_vm0, %v370_v44, 0.0 }
  0xc3   : > { %438 = vadd.xlane.f32.xlu0 %v437_v34  ;;  %444 = vadd.xlane.f32.xlu2 %v443_v40  ;;  %v255_v41 = vpop.xlane.xlu0 %254  ;;  %v449_v24 = vsel %vm180_vm0, %v371_v39, 0.0  ;;  %v258_v26 = vpop.xlane.xlu1 %257 }
  0xc4   : > { %v308_v25 = vmul.f32 %v1325_v15, %v255_v41  ;;  %v261_v45 = vpop.xlane.xlu2 %260  ;;  %450 = vadd.xlane.f32.xlu1 %v449_v24  ;;  %v309_v42 = vmul.f32 %v1325_v15, %v258_v26 }
  0xc5   : > { %v310_v43 = vmul.f32 %v1325_v15, %v261_v45 }
  0xc6   : > { %v340_v46 = vsub.f32 %v1286_v48, %v308_v25  ;;  %v341_v51 = vsub.f32 %v1289_v49, %v309_v42 }
  0xc7   : > { %v342_v47 = vsub.f32 %v1292_v50, %v310_v43 }
  0xc8   : > { %v372_v53 = vmul.f32 %v340_v46, %v340_v46  ;;  %v373_v50 = vmul.f32 %v341_v51, %v341_v51 }
  0xc9   : > { %v374_v57 = vmul.f32 %v342_v47, %v342_v47 }
  0xca   : > { %v452_v58 = vsel %vm180_vm0, %v372_v53, 0.0  ;;  %v455_v5 = vsel %vm180_vm0, %v373_v50, 0.0 }
  0xcb   : > { %447 = vadd.xlane.f32.xlu0 %v446_v52  ;;  %453 = vadd.xlane.f32.xlu2 %v452_v58  ;;  %v264_v59 = vpop.xlane.xlu0 %263  ;;  %v458_v62 = vsel %vm180_vm0, %v374_v57, 0.0  ;;  %v267_v63 = vpop.xlane.xlu1 %266 }
  0xcc   : > { %v311_v3 = vmul.f32 %v1325_v15, %v264_v59  ;;  %v270_v30 = vpop.xlane.xlu2 %269  ;;  %459 = vadd.xlane.f32.xlu1 %v458_v62  ;;  %v312_v48 = vmul.f32 %v1325_v15, %v267_v63 }
  0xcd   : > { %v313_v49 = vmul.f32 %v1325_v15, %v270_v30 }
  0xce   : > { %v343_v32 = vsub.f32 %v1301_v54, %v311_v3  ;;  %v344_v4 = vsub.f32 %v1304_v55, %v312_v48 }
  0xcf   : > { %v345_v31 = vsub.f32 %v1307_v56, %v313_v49 }
  0xd0   : > { %v375_v9 = vmul.f32 %v343_v32, %v343_v32  ;;  %v376_v56 = vmul.f32 %v344_v4, %v344_v4 }
  0xd1   : > { %v377_v10 = vmul.f32 %v345_v31, %v345_v31 }
  0xd2   : > { %v461_v11 = vsel %vm180_vm0, %v375_v9, 0.0  ;;  %v464_v23 = vsel %vm180_vm0, %v376_v56, 0.0 }
  0xd3   : > { %456 = vadd.xlane.f32.xlu0 %v455_v5  ;;  %462 = vadd.xlane.f32.xlu2 %v461_v11  ;;  %v273_v16 = vpop.xlane.xlu0 %272  ;;  %v467_v17 = vsel %vm180_vm0, %v377_v10, 0.0  ;;  %v276_v19 = vpop.xlane.xlu1 %275  ;;  %v1456_v11 = vld [vmem:[%s2057_s1] ss:$0 sm:$0xff] }
  0xd4   : > { %v314_v21 = vmul.f32 %v1325_v15, %v273_v16  ;;  %468 = vadd.xlane.f32.xlu1 %v467_v17  ;;  %v315_v54 = vmul.f32 %v1325_v15, %v276_v19 }
  0xd6   : > { %v346_v55 = vsub.f32 %v1316_v60, %v314_v21  ;;  %v347_v22 = vsub.f32 %v1319_v61, %v315_v54 }
  0xd8   : > { %v378_v27 = vmul.f32 %v346_v55, %v346_v55  ;;  %v379_v38 = vmul.f32 %v347_v22, %v347_v22 }
  0xda   : > { %v470_v36 = vsel %vm180_vm0, %v378_v27, 0.0  ;;  %v473_v37 = vsel %vm180_vm0, %v379_v38, 0.0 }
  0xdb   : > { %465 = vadd.xlane.f32.xlu0 %v464_v23  ;;  %471 = vadd.xlane.f32.xlu2 %v470_v36 }
  0xe3   : > { %474 = vadd.xlane.f32.xlu0 %v473_v37 }
  0xfe   : > { %v388_v28 = vpop.xlane.xlu1 %387  ;;  %v382_v29 = vpop.xlane.xlu2 %381 }
  0xff   : > { %v478_v33 = vmul.f32 %v388_v28, %v1325_v15  ;;  %v476_v34 = vmul.f32 %v382_v29, %v1325_v15 }
 0x101   : > { %v510_v60 = vadd.f32 1e-05, %v478_v33  ;;  %v508_v35 = vadd.f32 1e-05, %v476_v34 }
 0x103   : > { %1038 = vrsqrt.f32 %v510_v60  ;;  %vm566_vm2 = vweird.f32 %v510_v60  ;;  %vm546_vm4 = vweird.f32 %v508_v35 }
 0x104   : > { %1040 = vrsqrt.f32 %v508_v35 }
 0x106   : > { %v391_v61 = vpop.xlane.xlu2 %390  ;;  %v385_v39 = vpop.xlane.xlu0 %384 }
 0x107   : > { %v479_v40 = vmul.f32 %v391_v61, %v1325_v15  ;;  %v477_v41 = vmul.f32 %v385_v39, %v1325_v15  ;;  %v397_v24 = vpop.xlane.xlu1 %396 }
 0x108   : > { %v481_v26 = vmul.f32 %v397_v24, %v1325_v15 }
 0x109   : > { %v1039_v25 = vpop.eup %1038  ;;  %v1428_v45 = vadd.f32 1e-05, %v479_v40  ;;  %v1430_v42 = vadd.f32 1e-05, %v477_v41 }
 0x10a   : > { %v1041_v44 = vpop.eup %1040  ;;  %v561_v43 = vmul.f32 %v1039_v25, %v510_v60  ;;  %v1432_v46 = vadd.f32 1e-05, %v481_v26  ;;  %vm567_vm3 = vweird.f32 %v1039_v25 }
 0x10b   : > { %v541_v47 = vmul.f32 %v1041_v44, %v508_v35  ;;  %1042 = vrsqrt.f32 %v1428_v45  ;;  %vm547_vm5 = vweird.f32 %v1041_v44  ;;  %vm576_vm6 = vweird.f32 %v1428_v45  ;;  %vm568_vm7 = vmor %vm566_vm2, %vm567_vm3 }
 0x10c   : > { %v562_v51 = vmul.f32 %v1039_v25, %v561_v43  ;;  %1044 = vrsqrt.f32 %v1430_v42  ;;  %vm548_vm8 = vmor %vm546_vm4, %vm547_vm5  ;;  %vm596_vm9 = vweird.f32 %v1432_v46  ;;  %vm556_vm14 = vweird.f32 %v1430_v42 }
 0x10d   : > { %v542_v52 = vmul.f32 %v1041_v44, %v541_v47  ;;  %1046 = vrsqrt.f32 %v1432_v46 }
 0x10e   : > { %v563_v53 = vmul.f32 0.5, %v562_v51  ;;  %v400_v57 = vpop.xlane.xlu2 %399  ;;  %v394_v58 = vpop.xlane.xlu0 %393 }
 0x10f   : > { %v543_v59 = vmul.f32 0.5, %v542_v52  ;;  %v482_v62 = vmul.f32 %v400_v57, %v1325_v15  ;;  %v480_v63 = vmul.f32 %v394_v58, %v1325_v15  ;;  %v406_v3 = vpop.xlane.xlu1 %405 }
 0x110   : > { %v564_v30 = vsub.f32 1.5, %v563_v53  ;;  %v484_v48 = vmul.f32 %v406_v3, %v1325_v15 }
 0x111   : > { %v1440_v50 = vpop.eup %1042  ;;  %v544_v49 = vsub.f32 1.5, %v543_v59  ;;  %v1442_v32 = vadd.f32 1e-05, %v482_v62  ;;  %v1449_v9 = vadd.f32 1e-05, %v480_v63 }
 0x112   : > { %v1444_v31 = vpop.eup %1044  ;;  %v565_v4 = vmul.f32 %v1039_v25, %v564_v30  ;;  %v571_v5 = vmul.f32 %v1440_v50, %v1428_v45  ;;  %v1462_v19 = vadd.f32 1e-05, %v484_v48  ;;  %vm577_vm10 = vweird.f32 %v1440_v50 }
 0x113   : > { %v1451_v10 = vpop.eup %1046  ;;  %v545_v16 = vmul.f32 %v1041_v44, %v544_v49  ;;  %v551_v17 = vmul.f32 %v1444_v31, %v1430_v42  ;;  %1048 = vrsqrt.f32 %v1442_v32  ;;  %vm557_vm11 = vweird.f32 %v1444_v31  ;;  %vm578_vm13 = vmor %vm576_vm6, %vm577_vm10 }
 0x114   : > { %v569_v21 = vsel %vm568_vm7, %v1039_v25, %v565_v4  ;;  %v572_v54 = vmul.f32 %v1440_v50, %v571_v5  ;;  %v591_v56 = vmul.f32 %v1451_v10, %v1432_v46  ;;  %1050 = vrsqrt.f32 %v1449_v9  ;;  %vm558_vm2 = vmor %vm556_vm14, %vm557_vm11 }
 0x115   : > { %v862_v55 = vmul.f32 %v569_v21, %v1166_v0  ;;  %v549_v22 = vsel %vm548_vm8, %v1041_v44, %v545_v16  ;;  %v552_v23 = vmul.f32 %v1444_v31, %v551_v17  ;;  %1052 = vrsqrt.f32 %v1462_v19 }
 0x116   : > { %v860_v27 = vmul.f32 %v549_v22, %v1169_v1  ;;  %v573_v36 = vmul.f32 0.5, %v572_v54  ;;  %v592_v38 = vmul.f32 %v1451_v10, %v591_v56  ;;  %v409_v0 = vpop.xlane.xlu2 %408  ;;  %v403_v37 = vpop.xlane.xlu0 %402  ;;  %vm597_vm12 = vweird.f32 %v1451_v10 }
 0x117   : > { %v897_v28 = vmul.f32 %v1456_v11, %v862_v55  ;;  %v553_v29 = vmul.f32 0.5, %v552_v23  ;;  %v415_v33 = vpop.xlane.xlu1 %414  ;;  %v485_v39 = vmul.f32 %v409_v0, %v1325_v15  ;;  %v483_v40 = vmul.f32 %v403_v37, %v1325_v15  ;;  %vm1505_vm15 = vmor %vm596_vm9, %vm597_vm12 }
 0x118   : > { %v895_v34 = vmul.f32 %v1456_v11, %v860_v27  ;;  %v574_v1 = vsub.f32 1.5, %v573_v36  ;;  %v593_v60 = vmul.f32 0.5, %v592_v38  ;;  %v487_v41 = vmul.f32 %v415_v33, %v1325_v15 }
 0x119   : > { %v1049_v35 = vpop.eup %1048  ;;  %929 = vst.msk [vmem:[%s1478_s20 + $0x10] sm:$0xff] %vm180_vm0, %v897_v28  ;;  %v554_v61 = vsub.f32 1.5, %v553_v29  ;;  %vm606_vm1 = vweird.f32 %v1442_v32  ;;  %v1510_v47 = vadd.f32 1e-05, %v485_v39  ;;  %v1516_v42 = vadd.f32 1e-05, %v483_v40 }
 0x11a   : > { %927 = vst.msk [vmem:[%s1478_s20] sm:$0xff] %vm180_vm0, %v895_v34  ;;  %v575_v24 = vmul.f32 %v1440_v50, %v574_v1  ;;  %v594_v26 = vsub.f32 1.5, %v593_v60  ;;  %v601_v25 = vmul.f32 %v1049_v35, %v1442_v32  ;;  %v1051_v51 = vpop.eup %1050  ;;  %v1521_v62 = vadd.f32 1e-05, %v487_v41 }
 0x11b   : > { %v555_v44 = vmul.f32 %v1444_v31, %v554_v61  ;;  %v1053_v46 = vpop.eup %1052  ;;  %v581_v59 = vmul.f32 %v1051_v51, %v1449_v9  ;;  %vm607_vm3 = vweird.f32 %v1049_v35  ;;  %1054 = vrsqrt.f32 %v1510_v47 }
 0x11c   : > { %v579_v45 = vsel %vm578_vm13, %v1440_v50, %v575_v24  ;;  %v595_v52 = vmul.f32 %v1451_v10, %v594_v26  ;;  %v602_v53 = vmul.f32 %v1049_v35, %v601_v25  ;;  %v621_v48 = vmul.f32 %v1053_v46, %v1462_v19  ;;  %vm608_vm6 = vmor %vm606_vm1, %vm607_vm3 }
 0x11d   : > { %v863_v57 = vmul.f32 %v579_v45, %v1181_v6  ;;  %v559_v58 = vsel %vm558_vm2, %v1444_v31, %v555_v44  ;;  %v582_v4 = vmul.f32 %v1051_v51, %v581_v59  ;;  %vm626_vm4 = vweird.f32 %v1462_v19 }
 0x11e   : > { %v861_v63 = vmul.f32 %v559_v58, %v1184_v7  ;;  %v599_v3 = vsel %vm1505_vm15, %v1451_v10, %v595_v52  ;;  %v603_v30 = vmul.f32 0.5, %v602_v53  ;;  %v418_v50 = vpop.xlane.xlu2 %417  ;;  %v412_v49 = vpop.xlane.xlu0 %411  ;;  %v622_v17 = vmul.f32 %v1053_v46, %v621_v48  ;;  %v1104_v48 = vld [vmem:[%s1163_s15 + $0x70] sm:$0xff] }
 0x11f   : > { %v898_v6 = vmul.f32 %v1456_v11, %v863_v57  ;;  %v865_v31 = vmul.f32 %v599_v3, %v1187_v8  ;;  %v424_v5 = vpop.xlane.xlu1 %423  ;;  %v583_v21 = vmul.f32 0.5, %v582_v4  ;;  %1056 = vrsqrt.f32 %v1516_v42 }
 0x120   : > { %v896_v7 = vmul.f32 %v1456_v11, %v861_v63  ;;  %v604_v16 = vsub.f32 1.5, %v603_v30  ;;  %v623_v54 = vmul.f32 0.5, %v622_v17  ;;  %vm627_vm5 = vweird.f32 %v1053_v46 }
 0x121   : > { %930 = vst.msk [vmem:[%s1478_s20 + $0x18] sm:$0xff] %vm180_vm0, %v898_v6  ;;  %v900_v10 = vmul.f32 %v1456_v11, %v865_v31  ;;  %1058 = vrsqrt.f32 %v1521_v62  ;;  %v584_v56 = vsub.f32 1.5, %v583_v21  ;;  %vm587_vm7 = vweird.f32 %v1051_v51  ;;  %vm1552_vm9 = vmor %vm626_vm4, %vm627_vm5  ;;  %v1556_v37 = vpop.eup %1054 }
 0x122   : > { %928 = vst.msk [vmem:[%s1478_s20 + $0x8] sm:$0xff] %vm180_vm0, %v896_v7  ;;  %v605_v8 = vmul.f32 %v1049_v35, %v604_v16  ;;  %v488_v55 = vmul.f32 %v418_v50, %v1325_v15  ;;  %v486_v22 = vmul.f32 %v412_v49, %v1325_v15  ;;  %v624_v27 = vsub.f32 1.5, %v623_v54 }
 0x123   : > { %932 = vst.msk [vmem:[%s1478_s20 + $0x28] sm:$0xff] %vm180_vm0, %v900_v10  ;;  %v490_v36 = vmul.f32 %v424_v5, %v1325_v15  ;;  %v585_v0 = vmul.f32 %v1051_v51, %v584_v56  ;;  %vm586_vm8 = vweird.f32 %v1449_v9  ;;  %v631_v9 = vmul.f32 %v1556_v37, %v1510_v47 }
 0x124   : > { %v609_v23 = vsel %vm608_vm6, %v1049_v35, %v605_v8  ;;  %vm588_vm10 = vmor %vm586_vm8, %vm587_vm7  ;;  %v625_v28 = vmul.f32 %v1053_v46, %v624_v27  ;;  %v1558_v29 = vadd.f32 1e-05, %v488_v55  ;;  %v1563_v19 = vadd.f32 1e-05, %v486_v22 }
 0x125   : > { %v866_v38 = vmul.f32 %v609_v23, %v1196_v12  ;;  %v1057_v1 = vpop.eup %1056  ;;  %v589_v60 = vsel %vm588_vm10, %v1051_v51, %v585_v0  ;;  %v1571_v41 = vadd.f32 1e-05, %v490_v36  ;;  %v632_v26 = vmul.f32 %v1556_v37, %v631_v9 }
 0x126   : > { %v427_v33 = vpop.xlane.xlu2 %426  ;;  %v421_v34 = vpop.xlane.xlu0 %420  ;;  %v864_v61 = vmul.f32 %v589_v60, %v1172_v2  ;;  %v629_v39 = vsel %vm1552_vm9, %v1053_v46, %v625_v28  ;;  %v611_v40 = vmul.f32 %v1057_v1, %v1516_v42  ;;  %vm636_vm11 = vweird.f32 %v1510_v47 }
 0x127   : > { %v901_v12 = vmul.f32 %v1456_v11, %v866_v38  ;;  %v1565_v35 = vpop.eup %1058  ;;  %v868_v24 = vmul.f32 %v629_v39, %v1202_v14  ;;  %v433_v25 = vpop.xlane.xlu1 %432  ;;  %vm656_vm12 = vweird.f32 %v1521_v62  ;;  %1060 = vrsqrt.f32 %v1558_v29  ;;  %v1105_v39 = vld [vmem:[%s1163_s15 + $0x78] sm:$0xff] }
 0x128   : > { %v651_v2 = vmul.f32 %v1565_v35, %v1521_v62  ;;  %v899_v44 = vmul.f32 %v1456_v11, %v864_v61  ;;  %v612_v43 = vmul.f32 %v1057_v1, %v611_v40  ;;  %v633_v45 = vmul.f32 0.5, %v632_v26 }
 0x129   : > { %933 = vst.msk [vmem:[%s1478_s20 + $0x30] sm:$0xff] %vm180_vm0, %v901_v12  ;;  %v903_v51 = vmul.f32 %v1456_v11, %v868_v24  ;;  %1062 = vrsqrt.f32 %v1563_v19  ;;  %vm637_vm13 = vweird.f32 %v1556_v37  ;;  %vm657_vm14 = vweird.f32 %v1565_v35 }
 0x12a   : > { %v652_v14 = vmul.f32 %v1565_v35, %v651_v2  ;;  %931 = vst.msk [vmem:[%s1478_s20 + $0x20] sm:$0xff] %vm180_vm0, %v899_v44  ;;  %v613_v52 = vmul.f32 0.5, %v612_v43  ;;  %1064 = vrsqrt.f32 %v1571_v41  ;;  %v634_v53 = vsub.f32 1.5, %v633_v45  ;;  %vm1599_vm1 = vmor %vm636_vm11, %vm637_vm13 }
 0x12b   : > { %935 = vst.msk [vmem:[%s1478_s20 + $0x40] sm:$0xff] %vm180_vm0, %v903_v51  ;;  %v491_v57 = vmul.f32 %v427_v33, %v1325_v15  ;;  %v489_v58 = vmul.f32 %v421_v34, %v1325_v15  ;;  %vm617_vm15 = vweird.f32 %v1057_v1  ;;  %v493_v63 = vmul.f32 %v433_v25, %v1325_v15  ;;  %vm1611_vm4 = vmor %vm656_vm12, %vm657_vm14  ;;  %v1102_v51 = vld [vmem:[%s1163_s15 + $0x60] sm:$0xff] }
 0x12c   : > { %v653_v46 = vmul.f32 0.5, %v652_v14  ;;  %v614_v59 = vsub.f32 1.5, %v613_v52  ;;  %v635_v30 = vmul.f32 %v1556_v37, %v634_v53  ;;  %vm616_vm2 = vweird.f32 %v1516_v42 }
 0x12d   : > { %vm666_vm3 = vweird.f32 %v1558_v29  ;;  %v1605_v49 = vpop.eup %1060  ;;  %vm686_vm5 = vweird.f32 %v1571_v41  ;;  %v1616_v47 = vadd.f32 1e-05, %v491_v57  ;;  %v1618_v4 = vadd.f32 1e-05, %v489_v58  ;;  %vm618_vm6 = vmor %vm616_vm2, %vm617_vm15 }
 0x12e   : > { %v436_v3 = vpop.xlane.xlu2 %435  ;;  %v654_v50 = vsub.f32 1.5, %v653_v46  ;;  %v615_v6 = vmul.f32 %v1057_v1, %v614_v59  ;;  %v430_v42 = vpop.xlane.xlu0 %429  ;;  %v639_v7 = vsel %vm1599_vm1, %v1556_v37, %v635_v30  ;;  %v661_v16 = vmul.f32 %v1605_v49, %v1558_v29  ;;  %v1103_v46 = vld [vmem:[%s1163_s15 + $0x50] sm:$0xff] }
 0x12f   : > { %v1620_v5 = vpop.eup %1062  ;;  %v1629_v17 = vadd.f32 1e-05, %v493_v63  ;;  %v869_v21 = vmul.f32 %v639_v7, %v1211_v18  ;;  %v494_v56 = vmul.f32 %v436_v3, %v1325_v15  ;;  %v442_v18 = vpop.xlane.xlu1 %441  ;;  %1066 = vrsqrt.f32 %v1616_v47 }
 0x130   : > { %v655_v62 = vmul.f32 %v1565_v35, %v654_v50  ;;  %v1631_v10 = vpop.eup %1064  ;;  %v619_v8 = vsel %vm618_vm6, %v1057_v1, %v615_v6  ;;  %v641_v54 = vmul.f32 %v1620_v5, %v1563_v19  ;;  %v662_v23 = vmul.f32 %v1605_v49, %v661_v16 }
 0x131   : > { %v867_v55 = vmul.f32 %v619_v8, %v1199_v13  ;;  %v681_v27 = vmul.f32 %v1631_v10, %v1571_v41  ;;  %v904_v36 = vmul.f32 %v1456_v11, %v869_v21  ;;  %v492_v13 = vmul.f32 %v430_v42, %v1325_v15 }
 0x132   : > { %v659_v22 = vsel %vm1611_vm4, %v1565_v35, %v655_v62  ;;  %v642_v0 = vmul.f32 %v1620_v5, %v641_v54  ;;  %v663_v37 = vmul.f32 0.5, %v662_v23  ;;  %vm667_vm7 = vweird.f32 %v1605_v49 }
 0x133   : > { %v871_v38 = vmul.f32 %v659_v22, %v1217_v20  ;;  %v902_v32 = vmul.f32 %v1456_v11, %v867_v55  ;;  %v682_v28 = vmul.f32 %v1631_v10, %v681_v27  ;;  %936 = vst.msk [vmem:[%s1478_s20 + $0x48] sm:$0xff] %vm180_vm0, %v904_v36  ;;  %1068 = vrsqrt.f32 %v1618_v4  ;;  %vm1672_vm10 = vmor %vm666_vm3, %vm667_vm7 }
 0x134   : > { %v643_v34 = vmul.f32 0.5, %v642_v0  ;;  %v664_v20 = vsub.f32 1.5, %v663_v37  ;;  %vm687_vm8 = vweird.f32 %v1631_v10  ;;  %1070 = vrsqrt.f32 %v1629_v17 }
 0x135   : > { %v906_v33 = vmul.f32 %v1456_v11, %v871_v38  ;;  %934 = vst.msk [vmem:[%s1478_s20 + $0x38] sm:$0xff] %vm180_vm0, %v902_v32  ;;  %v683_v1 = vmul.f32 0.5, %v682_v28  ;;  %vm647_vm9 = vweird.f32 %v1620_v5  ;;  %v1663_v60 = vadd.f32 1e-05, %v494_v56  ;;  %vm1681_vm12 = vmor %vm686_vm5, %vm687_vm8  ;;  %v1687_v25 = vpop.eup %1066 }
 0x136   : > { %v644_v12 = vsub.f32 1.5, %v643_v34  ;;  %v1665_v9 = vadd.f32 1e-05, %v492_v13  ;;  %v445_v35 = vpop.xlane.xlu2 %444  ;;  %v665_v61 = vmul.f32 %v1605_v49, %v664_v20  ;;  %v496_v24 = vmul.f32 %v442_v18, %v1325_v15  ;;  %v439_v29 = vpop.xlane.xlu0 %438 }
 0x137   : > { %938 = vst.msk [vmem:[%s1478_s20 + $0x58] sm:$0xff] %vm180_vm0, %v906_v33  ;;  %v684_v40 = vsub.f32 1.5, %v683_v1  ;;  %vm646_vm11 = vweird.f32 %v1563_v19  ;;  %vm696_vm13 = vweird.f32 %v1616_v47  ;;  %1072 = vrsqrt.f32 %v1663_v60  ;;  %v451_v3 = vpop.xlane.xlu1 %450 }
 0x138   : > { %v645_v26 = vmul.f32 %v1620_v5, %v644_v12  ;;  %v669_v44 = vsel %vm1672_vm10, %v1605_v49, %v665_v61  ;;  %vm648_vm14 = vmor %vm646_vm11, %vm647_vm9  ;;  %1074 = vrsqrt.f32 %v1665_v9  ;;  %v1696_v41 = vadd.f32 1e-05, %v496_v24 }
 0x139   : > { %v685_v19 = vmul.f32 %v1631_v10, %v684_v40  ;;  %v1698_v43 = vpop.eup %1068  ;;  %v872_v45 = vmul.f32 %v1102_v51, %v669_v44  ;;  %v691_v52 = vmul.f32 %v1687_v25, %v1616_v47  ;;  %vm716_vm15 = vweird.f32 %v1629_v17 }
 0x13a   : > { %v649_v14 = vsel %vm648_vm14, %v1620_v5, %v645_v26  ;;  %v1705_v53 = vpop.eup %1070  ;;  %v671_v59 = vmul.f32 %v1698_v43, %v1618_v4  ;;  %vm676_vm1 = vweird.f32 %v1618_v4  ;;  %v497_v63 = vmul.f32 %v445_v35, %v1325_v15 }
 0x13b   : > { %v870_v57 = vmul.f32 %v1103_v46, %v649_v14  ;;  %v689_v58 = vsel %vm1681_vm12, %v1631_v10, %v685_v19  ;;  %v907_v30 = vmul.f32 %v1456_v11, %v872_v45  ;;  %v692_v49 = vmul.f32 %v1687_v25, %v691_v52 }
 0x13c   : > { %v874_v50 = vmul.f32 %v1104_v48, %v689_v58  ;;  %v711_v6 = vmul.f32 %v1705_v53, %v1629_v17  ;;  %vm697_vm2 = vweird.f32 %v1687_v25  ;;  %v672_v42 = vmul.f32 %v1698_v43, %v671_v59 }
 0x13d   : > { %v905_v31 = vmul.f32 %v1456_v11, %v870_v57  ;;  %vm726_vm3 = vweird.f32 %v1663_v60  ;;  %1076 = vrsqrt.f32 %v1696_v41  ;;  %v1725_v5 = vpop.eup %1072  ;;  %939 = vst.msk [vmem:[%s1478_s20 + $0x60] sm:$0xff] %vm180_vm0, %v907_v30  ;;  %v693_v62 = vmul.f32 0.5, %v692_v49  ;;  %vm1756_vm10 = vmor %vm696_vm13, %vm697_vm2 }
 0x13e   : > { %v909_v7 = vmul.f32 %v1456_v11, %v874_v50  ;;  %vm677_vm4 = vweird.f32 %v1698_v43  ;;  %v712_v16 = vmul.f32 %v1705_v53, %v711_v6  ;;  %v1732_v10 = vpop.eup %1074  ;;  %v673_v21 = vmul.f32 0.5, %v672_v42  ;;  %v454_v23 = vpop.xlane.xlu2 %453 }
 0x13f   : > { %937 = vst.msk [vmem:[%s1478_s20 + $0x50] sm:$0xff] %vm180_vm0, %v905_v31  ;;  %vm717_vm5 = vweird.f32 %v1705_v53  ;;  %v721_v8 = vmul.f32 %v1725_v5, %v1663_v60  ;;  %v1739_v54 = vadd.f32 1e-05, %v497_v63  ;;  %v694_v56 = vsub.f32 1.5, %v693_v62  ;;  %v448_v37 = vpop.xlane.xlu0 %447  ;;  %vm678_vm12 = vmor %vm676_vm1, %vm677_vm4  ;;  %v460_v2 = vpop.xlane.xlu1 %459  ;;  %v1108_v60 = vld [vmem:[%s1163_s15 + $0x90] sm:$0xff]  ;;  %v1109_v31 = vld [vmem:[%s1163_s15 + $0x80] sm:$0xff] }
 0x140   : > { %941 = vst.msk [vmem:[%s1478_s20 + $0x70] sm:$0xff] %vm180_vm0, %v909_v7  ;;  %v713_v55 = vmul.f32 0.5, %v712_v16  ;;  %vm727_vm6 = vweird.f32 %v1725_v5  ;;  %v701_v22 = vmul.f32 %v1732_v10, %v1665_v9  ;;  %vm706_vm7 = vweird.f32 %v1665_v9  ;;  %vm1769_vm11 = vmor %vm716_vm15, %vm717_vm5 }
 0x141   : > { %vm746_vm8 = vweird.f32 %v1696_v41  ;;  %v674_v27 = vsub.f32 1.5, %v673_v21  ;;  %v722_v18 = vmul.f32 %v1725_v5, %v721_v8  ;;  %vm707_vm9 = vweird.f32 %v1732_v10  ;;  %vm728_vm14 = vmor %vm726_vm3, %vm727_vm6 }
 0x142   : > { %1078 = vrsqrt.f32 %v1739_v54  ;;  %v695_v36 = vmul.f32 %v1687_v25, %v694_v56  ;;  %v714_v0 = vsub.f32 1.5, %v713_v55  ;;  %v702_v13 = vmul.f32 %v1732_v10, %v701_v22  ;;  %vm708_vm15 = vmor %vm706_vm7, %vm707_vm9 }
 0x143   : > { %v495_v32 = vmul.f32 %v439_v29, %v1325_v15  ;;  %v1762_v28 = vpop.eup %1076  ;;  %v675_v33 = vmul.f32 %v1698_v43, %v674_v27  ;;  %v723_v34 = vmul.f32 0.5, %v722_v18  ;;  %v499_v20 = vmul.f32 %v451_v3, %v1325_v15  ;;  %v1106_v29 = vld [vmem:[%s1163_s15 + $0x68] sm:$0xff]  ;;  %v1110_v27 = vld [vmem:[%s1163_s15 + $0xa0] sm:$0xff] }
 0x144   : > { %v500_v1 = vmul.f32 %v454_v23, %v1325_v15  ;;  %v699_v12 = vsel %vm1756_vm10, %v1687_v25, %v695_v36  ;;  %v715_v17 = vmul.f32 %v1705_v53, %v714_v0  ;;  %v703_v35 = vmul.f32 0.5, %v702_v13 }
 0x145   : > { %v741_v61 = vmul.f32 %v1762_v28, %v1696_v41  ;;  %v875_v40 = vmul.f32 %v1105_v39, %v699_v12  ;;  %v679_v24 = vsel %vm678_vm12, %v1698_v43, %v675_v33  ;;  %v724_v26 = vsub.f32 1.5, %v723_v34  ;;  %v1107_v43 = vld [vmem:[%s1163_s15 + $0x88] sm:$0xff] }
 0x146   : > { %vm747_vm13 = vweird.f32 %v1762_v28  ;;  %v873_v25 = vmul.f32 %v1106_v29, %v679_v24  ;;  %v719_v4 = vsel %vm1769_vm11, %v1705_v53, %v715_v17  ;;  %v704_v44 = vsub.f32 1.5, %v703_v35  ;;  %v463_v6 = vpop.xlane.xlu2 %462  ;;  %v1111_v35 = vld [vmem:[%s1163_s15 + $0xa8] sm:$0xff] }
 0x147   : > { %v742_v19 = vmul.f32 %v1762_v28, %v741_v61  ;;  %v910_v45 = vmul.f32 %v1456_v11, %v875_v40  ;;  %v877_v14 = vmul.f32 %v1107_v43, %v719_v4  ;;  %v725_v52 = vmul.f32 %v1725_v5, %v724_v26  ;;  %vm1829_vm1 = vmor %vm746_vm8, %vm747_vm13  ;;  %v457_v8 = vpop.xlane.xlu0 %456  ;;  %v469_v13 = vpop.xlane.xlu1 %468 }
 0x148   : > { %v1793_v51 = vpop.eup %1078  ;;  %v1798_v46 = vadd.f32 1e-05, %v495_v32  ;;  %v908_v57 = vmul.f32 %v1456_v11, %v873_v25  ;;  %v705_v53 = vmul.f32 %v1732_v10, %v704_v44  ;;  %v1835_v7 = vadd.f32 1e-05, %v500_v1 }
 0x149   : > { %v743_v58 = vmul.f32 0.5, %v742_v19  ;;  %v751_v59 = vmul.f32 %v1793_v51, %v1739_v54  ;;  %942 = vst.msk [vmem:[%s1478_s20 + $0x78] sm:$0xff] %vm180_vm0, %v910_v45  ;;  %v912_v63 = vmul.f32 %v1456_v11, %v877_v14  ;;  %v729_v3 = vsel %vm728_vm14, %v1725_v5, %v725_v52 }
 0x14a   : > { %1080 = vrsqrt.f32 %v1798_v46  ;;  %940 = vst.msk [vmem:[%s1478_s20 + $0x68] sm:$0xff] %vm180_vm0, %v908_v57  ;;  %v878_v30 = vmul.f32 %v1108_v60, %v729_v3  ;;  %v709_v48 = vsel %vm708_vm15, %v1732_v10, %v705_v53  ;;  %v1833_v5 = vadd.f32 1e-05, %v499_v20 }
 0x14b   : > { %v744_v50 = vsub.f32 1.5, %v743_v58  ;;  %v752_v49 = vmul.f32 %v1793_v51, %v751_v59  ;;  %944 = vst.msk [vmem:[%s1478_s20 + $0x88] sm:$0xff] %vm180_vm0, %v912_v63  ;;  %v876_v42 = vmul.f32 %v1109_v31, %v709_v48  ;;  %v498_v21 = vmul.f32 %v448_v37, %v1325_v15 }
 0x14c   : > { %v913_v62 = vmul.f32 %v1456_v11, %v878_v30  ;;  %vm756_vm2 = vweird.f32 %v1739_v54  ;;  %vm757_vm3 = vweird.f32 %v1793_v51  ;;  %1082 = vrsqrt.f32 %v1833_v5 }
 0x14d   : > { %v745_v16 = vmul.f32 %v1762_v28, %v744_v50  ;;  %v753_v10 = vmul.f32 0.5, %v752_v49  ;;  %v911_v41 = vmul.f32 %v1456_v11, %v876_v42  ;;  %1084 = vrsqrt.f32 %v1835_v7  ;;  %vm758_vm4 = vmor %vm756_vm2, %vm757_vm3  ;;  %v1112_v50 = vld [vmem:[%s1163_s15 + $0x98] sm:$0xff] }
 0x14e   : > { %945 = vst.msk [vmem:[%s1478_s20 + $0x90] sm:$0xff] %vm180_vm0, %v913_v62  ;;  %v1850_v22 = vadd.f32 1e-05, %v498_v21  ;;  %v502_v36 = vmul.f32 %v460_v2, %v1325_v15  ;;  %v503_v38 = vmul.f32 %v463_v6, %v1325_v15  ;;  %v501_v0 = vmul.f32 %v457_v8, %v1325_v15  ;;  %v472_v24 = vpop.xlane.xlu2 %471 }
 0x14f   : > { %v749_v56 = vsel %vm1829_vm1, %v1762_v28, %v745_v16  ;;  %v754_v55 = vsub.f32 1.5, %v753_v10  ;;  %943 = vst.msk [vmem:[%s1478_s20 + $0x80] sm:$0xff] %vm180_vm0, %v911_v41  ;;  %v505_v12 = vmul.f32 %v469_v13, %v1325_v15  ;;  %vm736_vm5 = vweird.f32 %v1798_v46  ;;  %v466_v43 = vpop.xlane.xlu0 %465 }
 0x150   : > { %v1852_v23 = vpop.eup %1080  ;;  %v880_v18 = vmul.f32 %v1110_v27, %v749_v56  ;;  %1086 = vrsqrt.f32 %v1850_v22  ;;  %v1869_v33 = vadd.f32 1e-05, %v502_v36  ;;  %v1871_v47 = vadd.f32 1e-05, %v503_v38 }
 0x151   : > { %v755_v32 = vmul.f32 %v1793_v51, %v754_v55  ;;  %v731_v37 = vmul.f32 %v1852_v23, %v1798_v46  ;;  %v1875_v1 = vadd.f32 1e-05, %v501_v0  ;;  %vm776_vm6 = vweird.f32 %v1833_v5 }
 0x152   : > { %v915_v28 = vmul.f32 %v1456_v11, %v880_v18  ;;  %v1878_v17 = vpop.eup %1082  ;;  %1088 = vrsqrt.f32 %v1869_v33  ;;  %vm786_vm7 = vweird.f32 %v1835_v7  ;;  %vm737_vm8 = vweird.f32 %v1852_v23  ;;  %v1113_v18 = vld [vmem:[%s1163_s15 + $0xb8] sm:$0xff] }
 0x153   : > { %v759_v34 = vsel %vm758_vm4, %v1793_v51, %v755_v32  ;;  %v732_v20 = vmul.f32 %v1852_v23, %v731_v37  ;;  %v1886_v54 = vpop.eup %1084  ;;  %v771_v40 = vmul.f32 %v1878_v17, %v1833_v5  ;;  %1090 = vrsqrt.f32 %v1871_v47  ;;  %vm738_vm13 = vmor %vm736_vm5, %vm737_vm8  ;;  %v1114_v32 = vld [vmem:[%s1163_s15 + $0xc0] sm:$0xff] }
 0x154   : > { %947 = vst.msk [vmem:[%s1478_s20 + $0xa0] sm:$0xff] %vm180_vm0, %v915_v28  ;;  %v881_v61 = vmul.f32 %v1111_v35, %v759_v34  ;;  %v781_v2 = vmul.f32 %v1886_v54, %v1835_v7  ;;  %1092 = vrsqrt.f32 %v1875_v1  ;;  %vm806_vm9 = vweird.f32 %v1869_v33 }
 0x155   : > { %v733_v39 = vmul.f32 0.5, %v732_v20  ;;  %v772_v4 = vmul.f32 %v1878_v17, %v771_v40  ;;  %v1901_v44 = vadd.f32 1e-05, %v505_v12  ;;  %vm777_vm10 = vweird.f32 %v1878_v17 }
 0x156   : > { %v916_v26 = vmul.f32 %v1456_v11, %v881_v61  ;;  %v1897_v29 = vpop.eup %1086  ;;  %v782_v19 = vmul.f32 %v1886_v54, %v781_v2  ;;  %vm766_vm11 = vweird.f32 %v1850_v22  ;;  %v506_v45 = vmul.f32 %v472_v24, %v1325_v15  ;;  %vm1938_vm1 = vmor %vm776_vm6, %vm777_vm10  ;;  %v1115_v61 = vld [vmem:[%s1163_s15 + $0xb0] sm:$0xff] }
 0x157   : > { %v734_v25 = vsub.f32 1.5, %v733_v39  ;;  %v761_v51 = vmul.f32 %v1897_v29, %v1850_v22  ;;  %v773_v52 = vmul.f32 0.5, %v772_v4  ;;  %vm787_vm12 = vweird.f32 %v1886_v54  ;;  %v475_v24 = vpop.xlane.xlu0 %474 }
 0x158   : > { %948 = vst.msk [vmem:[%s1478_s20 + $0xa8] sm:$0xff] %vm180_vm0, %v916_v26  ;;  %1094 = vrsqrt.f32 %v1901_v44  ;;  %v1914_v57 = vpop.eup %1088  ;;  %v783_v53 = vmul.f32 0.5, %v782_v19  ;;  %vm767_vm14 = vweird.f32 %v1897_v29  ;;  %vm816_vm15 = vweird.f32 %v1871_v47  ;;  %vm788_vm5 = vmor %vm786_vm7, %vm787_vm12  ;;  %v1116_v19 = vld [vmem:[%s1163_s15 + $0xd0] sm:$0xff] }
 0x159   : > { %v735_v14 = vmul.f32 %v1852_v23, %v734_v25  ;;  %v762_v58 = vmul.f32 %v1897_v29, %v761_v51  ;;  %v1923_v59 = vadd.f32 1e-05, %v506_v45  ;;  %v1925_v63 = vpop.eup %1090  ;;  %v774_v60 = vsub.f32 1.5, %v773_v52  ;;  %vm768_vm7 = vmor %vm766_vm11, %vm767_vm14 }
 0x15a   : > { %v801_v30 = vmul.f32 %v1914_v57, %v1869_v33  ;;  %v504_v46 = vmul.f32 %v466_v43, %v1325_v15  ;;  %v1931_v48 = vpop.eup %1092  ;;  %v784_v31 = vsub.f32 1.5, %v783_v53  ;;  %v811_v9 = vmul.f32 %v1925_v63, %v1871_v47  ;;  %v1117_v47 = vld [vmem:[%s1163_s15 + $0xd8] sm:$0xff] }
 0x15b   : > { %v739_v3 = vsel %vm738_vm13, %v1852_v23, %v735_v14  ;;  %v763_v42 = vmul.f32 0.5, %v762_v58  ;;  %v775_v62 = vmul.f32 %v1878_v17, %v774_v60  ;;  %vm807_vm2 = vweird.f32 %v1914_v57  ;;  %v1118_v58 = vld [vmem:[%s1163_s15 + $0xc8] sm:$0xff] }
 0x15c   : > { %v879_v49 = vmul.f32 %v1112_v50, %v739_v3  ;;  %v802_v16 = vmul.f32 %v1914_v57, %v801_v30  ;;  %v791_v5 = vmul.f32 %v1931_v48, %v1875_v1  ;;  %vm796_vm3 = vweird.f32 %v1875_v1  ;;  %vm1983_vm8 = vmor %vm806_vm9, %vm807_vm2 }
 0x15d   : > { %v785_v21 = vmul.f32 %v1886_v54, %v784_v31  ;;  %v764_v8 = vsub.f32 1.5, %v763_v42  ;;  %v812_v41 = vmul.f32 %v1925_v63, %v811_v9  ;;  %vm836_vm4 = vweird.f32 %v1901_v44 }
 0x15e   : > { %v914_v10 = vmul.f32 %v1456_v11, %v879_v49  ;;  %v1954_v56 = vpop.eup %1094  ;;  %v779_v55 = vsel %vm1938_vm1, %v1878_v17, %v775_v62  ;;  %v803_v23 = vmul.f32 0.5, %v802_v16  ;;  %vm817_vm6 = vweird.f32 %v1925_v63 }
 0x15f   : > { %v792_v27 = vmul.f32 %v1931_v48, %v791_v5  ;;  %v883_v36 = vmul.f32 %v1113_v18, %v779_v55  ;;  %v789_v38 = vsel %vm788_vm5, %v1886_v54, %v785_v21  ;;  %v765_v0 = vmul.f32 %v1897_v29, %v764_v8  ;;  %vm818_vm11 = vmor %vm816_vm15, %vm817_vm6  ;;  %v1120_v18 = vld [vmem:[%s1163_s15 + $0xf0] sm:$0xff] }
 0x160   : > { %946 = vst.msk [vmem:[%s1478_s20 + $0x98] sm:$0xff] %vm180_vm0, %v914_v10  ;;  %v813_v13 = vmul.f32 0.5, %v812_v41  ;;  %v884_v37 = vmul.f32 %v1114_v32, %v789_v38  ;;  %v804_v7 = vsub.f32 1.5, %v803_v23  ;;  %v831_v34 = vmul.f32 %v1954_v56, %v1901_v44  ;;  %v1119_v44 = vld [vmem:[%s1163_s15 + $0xe8] sm:$0xff]  ;;  %v1121_v32 = vld [vmem:[%s1163_s15 + $0xe0] sm:$0xff] }
 0x161   : > { %v793_v28 = vmul.f32 0.5, %v792_v27  ;;  %v918_v20 = vmul.f32 %v1456_v11, %v883_v36  ;;  %v769_v12 = vsel %vm768_vm7, %v1897_v29, %v765_v0  ;;  %vm797_vm10 = vweird.f32 %v1931_v48 }
 0x162   : > { %v814_v22 = vsub.f32 1.5, %v813_v13  ;;  %v919_v35 = vmul.f32 %v1456_v11, %v884_v37  ;;  %v882_v54 = vmul.f32 %v1115_v61, %v769_v12  ;;  %v805_v39 = vmul.f32 %v1914_v57, %v804_v7  ;;  %vm798_vm12 = vmor %vm796_vm3, %vm797_vm10 }
 0x163   : > { %v794_v40 = vsub.f32 1.5, %v793_v28  ;;  %950 = vst.msk [vmem:[%s1478_s20 + $0xb8] sm:$0xff] %vm180_vm0, %v918_v20  ;;  %v832_v26 = vmul.f32 %v1954_v56, %v831_v34  ;;  %vm837_vm9 = vweird.f32 %v1954_v56  ;;  %1096 = vrsqrt.f32 %v1923_v59  ;;  %v1122_v20 = vld [vmem:[%s1163_s15 + $0xf8] sm:$0xff] }
 0x164   : > { %v815_v33 = vmul.f32 %v1925_v63, %v814_v22  ;;  %951 = vst.msk [vmem:[%s1478_s20 + $0xc0] sm:$0xff] %vm180_vm0, %v919_v35  ;;  %v917_v2 = vmul.f32 %v1456_v11, %v882_v54  ;;  %v809_v29 = vsel %vm1983_vm8, %v1914_v57, %v805_v39  ;;  %v536_v4 = vadd.f32 1e-05, %v504_v46  ;;  %vm838_vm13 = vmor %vm836_vm4, %vm837_vm9 }
 0x165   : > { %v795_v25 = vmul.f32 %v1931_v48, %v794_v40  ;;  %v886_v51 = vmul.f32 %v1116_v19, %v809_v29  ;;  %v833_v43 = vmul.f32 0.5, %v832_v26  ;;  %v507_v14 = vmul.f32 %v475_v24, %v1325_v15 }
 0x166   : > { %v819_v45 = vsel %vm818_vm11, %v1925_v63, %v815_v33  ;;  %949 = vst.msk [vmem:[%s1478_s20 + $0xb0] sm:$0xff] %vm180_vm0, %v917_v2  ;;  %1098 = vrsqrt.f32 %v536_v4  ;;  %vm846_vm14 = vweird.f32 %v1923_v59  ;;  %vm826_vm3 = vweird.f32 %v536_v4 }
 0x167   : > { %v887_v52 = vmul.f32 %v1117_v47, %v819_v45  ;;  %v799_v57 = vsel %vm798_vm12, %v1931_v48, %v795_v25  ;;  %v921_v53 = vmul.f32 %v1456_v11, %v886_v51  ;;  %v834_v1 = vsub.f32 1.5, %v833_v43 }
 0x168   : > { %v885_v63 = vmul.f32 %v1118_v58, %v799_v57  ;;  %v539_v3 = vadd.f32 1e-05, %v507_v14 }
 0x169   : > { %v922_v60 = vmul.f32 %v1456_v11, %v887_v52  ;;  %v1097_v15 = vpop.eup %1096  ;;  %953 = vst.msk [vmem:[%s1478_s20 + $0xd0] sm:$0xff] %vm180_vm0, %v921_v53  ;;  %v835_v46 = vmul.f32 %v1954_v56, %v834_v1 }
 0x16a   : > { %v920_v30 = vmul.f32 %v1456_v11, %v885_v63  ;;  %1100 = vrsqrt.f32 %v539_v3  ;;  %v841_v48 = vmul.f32 %v1097_v15, %v1923_v59  ;;  %vm847_vm15 = vweird.f32 %v1097_v15 }
 0x16b   : > { %954 = vst.msk [vmem:[%s1478_s20 + $0xd8] sm:$0xff] %vm180_vm0, %v922_v60  ;;  %v839_v50 = vsel %vm838_vm13, %v1954_v56, %v835_v46  ;;  %vm848_vm1 = vmor %vm846_vm14, %vm847_vm15  ;;  %vm856_vm6 = vweird.f32 %v539_v3 }
 0x16c   : > { %952 = vst.msk [vmem:[%s1478_s20 + $0xc8] sm:$0xff] %vm180_vm0, %v920_v30  ;;  %v1099_v49 = vpop.eup %1098  ;;  %v889_v6 = vmul.f32 %v1119_v44, %v839_v50  ;;  %v842_v31 = vmul.f32 %v1097_v15, %v841_v48 }
 0x16d   : > { %v821_v42 = vmul.f32 %v1099_v49, %v536_v4  ;;  %vm827_vm2 = vweird.f32 %v1099_v49 }
 0x16e   : > { %v924_v9 = vmul.f32 %v1456_v11, %v889_v6  ;;  %v843_v62 = vmul.f32 0.5, %v842_v31  ;;  %vm828_vm4 = vmor %vm826_vm3, %vm827_vm2 }
 0x16f   : > { %v822_v5 = vmul.f32 %v1099_v49, %v821_v42 }
 0x170   : > { %v1101_v16 = vpop.eup %1100  ;;  %956 = vst.msk [vmem:[%s1478_s20 + $0xe8] sm:$0xff] %vm180_vm0, %v924_v9  ;;  %v844_v10 = vsub.f32 1.5, %v843_v62 }
 0x171   : > { %v851_v21 = vmul.f32 %v1101_v16, %v539_v3  ;;  %v823_v8 = vmul.f32 0.5, %v822_v5  ;;  %vm857_vm5 = vweird.f32 %v1101_v16 }
 0x172   : > { %v845_v41 = vmul.f32 %v1097_v15, %v844_v10  ;;  %vm858_vm7 = vmor %vm856_vm6, %vm857_vm5 }
 0x173   : > { %v852_v56 = vmul.f32 %v1101_v16, %v851_v21  ;;  %v824_v55 = vsub.f32 1.5, %v823_v8 }
 0x174   : > { %v849_v23 = vsel %vm848_vm1, %v1097_v15, %v845_v41 }
 0x175   : > { %v853_v27 = vmul.f32 0.5, %v852_v56  ;;  %v890_v36 = vmul.f32 %v1120_v18, %v849_v23  ;;  %v825_v38 = vmul.f32 %v1099_v49, %v824_v55 }
 0x177   : > { %v854_v59 = vsub.f32 1.5, %v853_v27  ;;  %v925_v0 = vmul.f32 %v1456_v11, %v890_v36  ;;  %v829_v13 = vsel %vm828_vm4, %v1099_v49, %v825_v38 }
 0x178   : > { %v888_v37 = vmul.f32 %v1121_v32, %v829_v13 }
 0x179   : > { %v855_v7 = vmul.f32 %v1101_v16, %v854_v59  ;;  %957 = vst.msk [vmem:[%s1478_s20 + $0xf0] sm:$0xff] %vm180_vm0, %v925_v0 }
 0x17a   : > { %v923_v28 = vmul.f32 %v1456_v11, %v888_v37 }
 0x17b   : > { %v859_v34 = vsel %vm858_vm7, %v1101_v16, %v855_v7 }
 0x17c   : > { %v891_v12 = vmul.f32 %v1122_v20, %v859_v34  ;;  %955 = vst.msk [vmem:[%s1478_s20 + $0xe0] sm:$0xff] %vm180_vm0, %v923_v28 }
 0x17e   : > { %v926_v17 = vmul.f32 %v1456_v11, %v891_v12 }
 0x180   : > { %958 = vst.msk [vmem:[%s1478_s20 + $0xf8] sm:$0xff] %vm180_vm0, %v926_v17 }
 0x181 PF: > { %s12_s9 = sadd.s32 1, %s1129_s9  }
 0x182   : > { %p9_p4 = scmp.ge.s32.totalorder %s12_s9, 4  }
 0x184   :  { %11 = sbr.rel (!%p9_p4) target bundleno = 1 (0x1), region = 58 }

</bundles_post_ra>
